<compile_context>
chip_gen: v7x
topology: tpu7x:2x2x1
jax: 0.10.0
libtpu: 0.0.40
codegen_flags: <defaults>
</compile_context>

<pallas_src>
import functools

import jax
import jax.numpy as jnp
from jax.experimental import pallas as pl
from jax.experimental.pallas import tpu as pltpu

EPS = 1e-5          # PyTorch BatchNorm1d default eps
LANES = 128


def _round_up(x, m):
    return ((x + m - 1) // m) * m


# --------------------------------------------------------------------------
# Parameter packing: one f32 slab, everything zero-padded to 128 lanes.
#   rows [0, L)        : w1 rows (lane-padded)
#   row  L + 0 .. L + 6: b1, g1, be1, b2, g2, be2, b3
#   rows [r2, r2+128)  : w2 zero-padded to (128, 128)
#   rows [r3, r3+128)  : w3 zero-padded to (128, 128)
# --------------------------------------------------------------------------
def pack_params(params):
    (w1, b1, g1, be1, w2, b2, g2, be2, w3, b3) = params
    L = w1.shape[0]
    d2 = w1.shape[1]
    d1 = w2.shape[1]
    d0 = w3.shape[1]
    assert d2 <= LANES and d1 <= LANES and d0 <= LANES, "layer width > 128 lanes"
    assert w2.shape[0] == d2 and w3.shape[0] == d1

    r2 = _round_up(L + 7, 8)
    r3 = _round_up(r2 + LANES, 8)
    rows = _round_up(r3 + LANES, 8)

    slab = jnp.zeros((rows, LANES), jnp.float32)
    slab = slab.at[0:L, 0:d2].set(w1)
    slab = slab.at[L + 0, 0:d2].set(b1.reshape(-1))
    slab = slab.at[L + 1, 0:d2].set(g1.reshape(-1))
    slab = slab.at[L + 2, 0:d2].set(be1.reshape(-1))
    slab = slab.at[L + 3, 0:d1].set(b2.reshape(-1))
    slab = slab.at[L + 4, 0:d1].set(g2.reshape(-1))
    slab = slab.at[L + 5, 0:d1].set(be2.reshape(-1))
    slab = slab.at[L + 6, 0:d0].set(b3.reshape(-1))
    slab = slab.at[r2:r2 + d2, 0:d1].set(w2)
    slab = slab.at[r3:r3 + d1, 0:d0].set(w3)
    return slab, (L, d2, d1, d0, r2, r3)


# --------------------------------------------------------------------------
# Fused single-block kernel (small / medium batch: everything lives in VMEM).
# --------------------------------------------------------------------------
def _bn_train(h, gamma, beta, inv_n):
    """Training-mode BatchNorm1d with two-pass (h - m)^2 variance."""
    m = jnp.sum(h, axis=0, keepdims=True) * inv_n
    c = h - m
    var = jnp.sum(c * c, axis=0, keepdims=True) * inv_n
    scale = gamma * jax.lax.rsqrt(var + EPS)
    return c * scale + beta


def _decoder_fused_kernel(z_ref, p_ref, out_ref, *, n_latent, d0, r2, r3, inv_b):
    L = n_latent
    z = z_ref[...]                                   # (B, L) f32

    b1 = p_ref[L + 0:L + 1, :]
    g1 = p_ref[L + 1:L + 2, :]
    be1 = p_ref[L + 2:L + 3, :]
    b2 = p_ref[L + 3:L + 4, :]
    g2 = p_ref[L + 4:L + 5, :]
    be2 = p_ref[L + 5:L + 6, :]
    b3 = p_ref[L + 6:L + 7, :]

    # fc_dec_l: Linear(L -> d2) as L VPU FMAs (K tiny; skip the MXU).
    h = b1
    for k in range(L):
        h = h + z[:, k:k + 1] * p_ref[k:k + 1, :]    # (B, 128)
    h = jnp.maximum(h, 0.0)
    h = _bn_train(h, g1, be1, inv_b)

    # fc_dec2: (B,128) @ (128,128) f32 MXU dot (rows >= d2 of w2 are zero).
    w2 = p_ref[r2:r2 + LANES, :]
    h = jnp.maximum(jnp.dot(h, w2, preferred_element_type=jnp.float32) + b2, 0.0)
    h = _bn_train(h, g2, be2, inv_b)

    # fc_dec1: (B,128) @ (128,128), sigmoid.
    w3 = p_ref[r3:r3 + LANES, :]
    h = jnp.dot(h, w3, preferred_element_type=jnp.float32) + b3
    if d0 < LANES:
        h = h[:, :d0]
    out_ref[...] = jax.nn.sigmoid(h)


def _decode_fused(z, packed):
    slab, (L, d2, d1, d0, r2, r3) = packed
    B = z.shape[0]
    kernel = functools.partial(_decoder_fused_kernel, n_latent=L, d0=d0,
                               r2=r2, r3=r3, inv_b=1.0 / B)

    full_vmem = lambda a: pl.BlockSpec(a.shape, lambda: (0,) * a.ndim,
                                       memory_space=pltpu.MemorySpace.VMEM)
    return pl.pallas_call(
        kernel,
        out_shape=jax.ShapeDtypeStruct((B, d0), jnp.float32),
        in_specs=[full_vmem(z), full_vmem(slab)],
        out_specs=pl.BlockSpec((B, d0), lambda: (0, 0),
                               memory_space=pltpu.MemorySpace.VMEM),
    )(z, slab)


# --------------------------------------------------------------------------
# Large-batch path: 3 stages with a *parallel* batch grid axis.
# BN statistics are per-tile partial (sum, sum_sq) output blocks, reduced in
# the next stage; weights stay resident in VMEM across the whole grid.
# --------------------------------------------------------------------------
def _dec_stage1_kernel(z_ref, p_ref, h1_ref, s1_ref, *, n_latent):
    L = n_latent
    z = z_ref[...]                                   # (tb, L)
    h = p_ref[L:L + 1, :]                            # b1
    for k in range(L):
        h = h + z[:, k:k + 1] * p_ref[k:k + 1, :]
    h = jnp.maximum(h, 0.0)
    h1_ref[...] = h
    s1_ref[0:1, 0:1, :] = jnp.sum(h, axis=0, keepdims=True).reshape(1, 1, LANES)
    s1_ref[0:1, 1:2, :] = jnp.sum(h * h, axis=0, keepdims=True).reshape(1, 1, LANES)


def _dec_stage2_kernel(h1_ref, s1_ref, p_ref, h2_ref, s2_ref, *,
                       n_latent, r2, inv_b):
    L = n_latent
    g1 = p_ref[L + 1:L + 2, :]
    be1 = p_ref[L + 2:L + 3, :]
    b2 = p_ref[L + 3:L + 4, :]

    st = jnp.sum(s1_ref[...], axis=0)                # (2, 128) total stats
    m = st[0:1, :] * inv_b
    var = jnp.maximum(st[1:2, :] * inv_b - m * m, 0.0)
    scale = g1 * jax.lax.rsqrt(var + EPS)
    shift = be1 - m * scale

    h = h1_ref[...] * scale + shift
    w2 = p_ref[r2:r2 + LANES, :]
    h = jnp.maximum(jnp.dot(h, w2, preferred_element_type=jnp.float32) + b2, 0.0)
    h2_ref[...] = h
    s2_ref[0:1, 0:1, :] = jnp.sum(h, axis=0, keepdims=True).reshape(1, 1, LANES)
    s2_ref[0:1, 1:2, :] = jnp.sum(h * h, axis=0, keepdims=True).reshape(1, 1, LANES)


def _dec_stage3_kernel(h2_ref, s2_ref, p_ref, out_ref, *,
                       n_latent, r3, d0, inv_b):
    L = n_latent
    g2 = p_ref[L + 4:L + 5, :]
    be2 = p_ref[L + 5:L + 6, :]
    b3 = p_ref[L + 6:L + 7, :]

    st = jnp.sum(s2_ref[...], axis=0)
    m = st[0:1, :] * inv_b
    var = jnp.maximum(st[1:2, :] * inv_b - m * m, 0.0)
    scale = g2 * jax.lax.rsqrt(var + EPS)
    shift = be2 - m * scale

    h = h2_ref[...] * scale + shift
    w3 = p_ref[r3:r3 + LANES, :]
    h = jnp.dot(h, w3, preferred_element_type=jnp.float32) + b3
    if d0 < LANES:
        h = h[:, :d0]
    out_ref[...] = jax.nn.sigmoid(h)


def _decode_tiled(z, packed, batch_tile):
    slab, (L, d2, d1, d0, r2, r3) = packed
    B = z.shape[0]
    assert batch_tile % 8 == 0 and B % batch_tile == 0, \
        "batch must be a multiple of batch_tile (and batch_tile of 8)"
    T = B // batch_tile
    inv_b = 1.0 / B
    parallel = pltpu.CompilerParams(dimension_semantics=("parallel",))

    slab_spec = pl.BlockSpec(slab.shape, lambda t: (0, 0))        # resident
    act_spec = pl.BlockSpec((batch_tile, LANES), lambda t: (t, 0))
    stat_out_spec = pl.BlockSpec((1, 2, LANES), lambda t: (t, 0, 0))
    stat_in_spec = pl.BlockSpec((T, 2, LANES), lambda t: (0, 0, 0))

    h1, s1 = pl.pallas_call(
        functools.partial(_dec_stage1_kernel, n_latent=L),
        grid=(T,),
        out_shape=(jax.ShapeDtypeStruct((B, LANES), jnp.float32),
                   jax.ShapeDtypeStruct((T, 2, LANES), jnp.float32)),
        in_specs=[pl.BlockSpec((batch_tile, L), lambda t: (t, 0)), slab_spec],
        out_specs=(act_spec, stat_out_spec),
        compiler_params=parallel,
    )(z, slab)

    h2, s2 = pl.pallas_call(
        functools.partial(_dec_stage2_kernel, n_latent=L, r2=r2, inv_b=inv_b),
        grid=(T,),
        out_shape=(jax.ShapeDtypeStruct((B, LANES), jnp.float32),
                   jax.ShapeDtypeStruct((T, 2, LANES), jnp.float32)),
        in_specs=[act_spec, stat_in_spec, slab_spec],
        out_specs=(act_spec, stat_out_spec),
        compiler_params=parallel,
    )(h1, s1, slab)

    out = pl.pallas_call(
        functools.partial(_dec_stage3_kernel, n_latent=L, r3=r3, d0=d0,
                          inv_b=inv_b),
        grid=(T,),
        out_shape=jax.ShapeDtypeStruct((B, d0), jnp.float32),
        in_specs=[act_spec, stat_in_spec, slab_spec],
        out_specs=pl.BlockSpec((batch_tile, d0), lambda t: (t, 0)),
        compiler_params=parallel,
    )(h2, s2, slab)
    return out


# --------------------------------------------------------------------------
# Public API
# --------------------------------------------------------------------------
def decoder_decode(z, packed, batch_tile=None):
    """decode() hot path.  Fused single-VMEM-block kernel by default; with
    batch_tile set (e.g. 1024) and B > batch_tile, uses the 3-stage tiled
    path with a megacore-parallel batch grid axis."""
    if batch_tile is None or z.shape[0] <= batch_tile:
        return _decode_fused(z, packed)
    return _decode_tiled(z, packed, batch_tile)


def decoder_forward(inputs, packed, batch_tile=None):
    """Mirrors Decoder.forward: input = (z, mu, logvar)."""
    z, mu, logvar = inputs
    decoded = decoder_decode(z, packed, batch_tile)
    return decoded, z, mu, logvar


# --------------------------------------------------------------------------
# Pure-JAX reference (matches the PyTorch module, training-mode BN)
# --------------------------------------------------------------------------
def decoder_reference(z, params):
    (w1, b1, g1, be1, w2, b2, g2, be2, w3, b3) = params
    hp = jax.lax.Precision.HIGHEST

    def bn(h, g, b):
        m = jnp.mean(h, axis=0, keepdims=True)
        v = jnp.mean((h - m) ** 2, axis=0, keepdims=True)
        return (h - m) * jax.lax.rsqrt(v + EPS) * g + b

    h = bn(jnp.maximum(jnp.dot(z, w1, precision=hp) + b1, 0.0), g1, be1)
    h = bn(jnp.maximum(jnp.dot(h, w2, precision=hp) + b2, 0.0), g2, be2)
    return jax.nn.sigmoid(jnp.dot(h, w3, precision=hp) + b3)


def init_params(key, n_mito_input_layer=128, n_latent_vector=2, factor=0.5):
    """Deterministic synthetic parameters matching the module's shapes."""
    d2 = int(n_mito_input_layer * factor ** 2)   # 32
    d1 = int(n_mito_input_layer * factor)        # 64
    d0 = int(n_mito_input_layer)                 # 128
    keys = jax.random.split(key, 6)

    def linear_init(kw, kb, fan_in, fan_out):
        bound = 1.0 / jnp.sqrt(float(fan_in))
        w = jax.random.uniform(kw, (fan_in, fan_out), jnp.float32, -bound, bound)
        b = jax.random.uniform(kb, (1, fan_out), jnp.float32, -bound, bound)
        return w, b

    w1, b1 = linear_init(keys[0], keys[1], n_latent_vector, d2)  # fc_dec_l
    w2, b2 = linear_init(keys[2], keys[3], d2, d1)               # fc_dec2
    w3, b3 = linear_init(keys[4], keys[5], d1, d0)               # fc_dec1

    g1 = jnp.ones((1, d2), jnp.float32)
    be1 = jnp.zeros((1, d2), jnp.float32)
    g2 = jnp.ones((1, d1), jnp.float32)
    be2 = jnp.zeros((1, d1), jnp.float32)
    return (w1, b1, g1, be1, w2, b2, g2, be2, w3, b3)


if __name__ == "__main__":
    key = jax.random.PRNGKey(0)
    k_params, k_z, k_mu, k_lv, k_zb = jax.random.split(key, 5)

    n_mito = 128
    n_latent = 2
    batch = 8

    params = init_params(k_params, n_mito_input_layer=n_mito,
                         n_latent_vector=n_latent)
    packed = pack_params(params)      # one-time host-side packing

    z = jax.random.normal(k_z, (batch, n_latent), jnp.float32)
    mu = jax.random.normal(k_mu, (batch, n_latent), jnp.float32)
    logvar = jax.random.normal(k_lv, (batch, n_latent), jnp.float32)

    # ---- fused small-batch path ----
    decoded, z_out, mu_out, lv_out = decoder_forward((z, mu, logvar), packed)
    jax.block_until_ready(decoded)
    ref = decoder_reference(z, params)

    assert decoded.shape == (batch, n_mito)
    assert decoded.dtype == jnp.float32
    assert bool(jnp.all((decoded >= 0.0) & (decoded <= 1.0)))
    assert bool(jnp.allclose(decoded, ref, atol=2e-3, rtol=2e-3))
    assert bool(jnp.all(z_out == z)) and bool(jnp.all(mu_out == mu))
    assert bool(jnp.all(lv_out == logvar))

    # ---- tiled batch-grid path (megacore-parallel), small demo size ----
    batch_big = 256
    zb = jax.random.normal(k_zb, (batch_big, n_latent), jnp.float32)
    decoded_b = decoder_decode(zb, packed, batch_tile=128)
    jax.block_until_ready(decoded_b)
    ref_b = decoder_reference(zb, params)

    assert decoded_b.shape == (batch_big, n_mito)
    assert bool(jnp.allclose(decoded_b, ref_b, atol=2e-3, rtol=2e-3))

    print("KERNEL_OK")
</pallas_src>

<mosaic_0001>
module attributes {stable_mosaic.version = 11 : i64} {
  func.func @_decoder_fused_kernel(%arg0: memref<8x2xf32, #tpu.memory_space<vmem>>, %arg1: memref<272x128xf32, #tpu.memory_space<vmem>>, %arg2: memref<8x128xf32, #tpu.memory_space<vmem>>) attributes {dimension_semantics = [], scalar_prefetch = 0 : i64, scratch_operands = 0 : i64, tpu.core_type = #tpu.core_type<tc>} {
    %c0 = arith.constant 0 : index
    %c0_0 = arith.constant 0 : index
    %0 = vector.load %arg0[%c0, %c0_0] : memref<8x2xf32, #tpu.memory_space<vmem>>, vector<8x2xf32>
    %c2 = arith.constant 2 : index
    %c0_1 = arith.constant 0 : index
    %1 = vector.load %arg1[%c2, %c0_1] : memref<272x128xf32, #tpu.memory_space<vmem>>, vector<1x128xf32>
    %c3 = arith.constant 3 : index
    %c0_2 = arith.constant 0 : index
    %2 = vector.load %arg1[%c3, %c0_2] : memref<272x128xf32, #tpu.memory_space<vmem>>, vector<1x128xf32>
    %c4 = arith.constant 4 : index
    %c0_3 = arith.constant 0 : index
    %3 = vector.load %arg1[%c4, %c0_3] : memref<272x128xf32, #tpu.memory_space<vmem>>, vector<1x128xf32>
    %c5 = arith.constant 5 : index
    %c0_4 = arith.constant 0 : index
    %4 = vector.load %arg1[%c5, %c0_4] : memref<272x128xf32, #tpu.memory_space<vmem>>, vector<1x128xf32>
    %c6 = arith.constant 6 : index
    %c0_5 = arith.constant 0 : index
    %5 = vector.load %arg1[%c6, %c0_5] : memref<272x128xf32, #tpu.memory_space<vmem>>, vector<1x128xf32>
    %c7 = arith.constant 7 : index
    %c0_6 = arith.constant 0 : index
    %6 = vector.load %arg1[%c7, %c0_6] : memref<272x128xf32, #tpu.memory_space<vmem>>, vector<1x128xf32>
    %c8 = arith.constant 8 : index
    %c0_7 = arith.constant 0 : index
    %7 = vector.load %arg1[%c8, %c0_7] : memref<272x128xf32, #tpu.memory_space<vmem>>, vector<1x128xf32>
    %8 = vector.extract_strided_slice %0 {offsets = [0, 0], sizes = [8, 1], strides = [1, 1]} : vector<8x2xf32> to vector<8x1xf32>
    %c0_8 = arith.constant 0 : index
    %c0_9 = arith.constant 0 : index
    %9 = vector.load %arg1[%c0_8, %c0_9] : memref<272x128xf32, #tpu.memory_space<vmem>>, vector<1x128xf32>
    %10 = vector.broadcast %8 : vector<8x1xf32> to vector<8x128xf32>
    %11 = vector.broadcast %9 : vector<1x128xf32> to vector<8x128xf32>
    %12 = arith.mulf %10, %11 : vector<8x128xf32>
    %13 = vector.broadcast %1 : vector<1x128xf32> to vector<8x128xf32>
    %14 = arith.addf %13, %12 : vector<8x128xf32>
    %15 = vector.extract_strided_slice %0 {offsets = [0, 1], sizes = [8, 1], strides = [1, 1]} : vector<8x2xf32> to vector<8x1xf32>
    %c1 = arith.constant 1 : index
    %c0_10 = arith.constant 0 : index
    %16 = vector.load %arg1[%c1, %c0_10] : memref<272x128xf32, #tpu.memory_space<vmem>>, vector<1x128xf32>
    %17 = vector.broadcast %15 : vector<8x1xf32> to vector<8x128xf32>
    %18 = vector.broadcast %16 : vector<1x128xf32> to vector<8x128xf32>
    %19 = arith.mulf %17, %18 : vector<8x128xf32>
    %20 = arith.addf %14, %19 : vector<8x128xf32>
    %cst = arith.constant 0.000000e+00 : f32
    %21 = vector.broadcast %cst : f32 to vector<8x128xf32>
    %22 = arith.maximumf %20, %21 : vector<8x128xf32>
    %cst_11 = arith.constant dense<0.000000e+00> : vector<128xf32>
    %23 = vector.multi_reduction <add>, %22, %cst_11 [0] : vector<8x128xf32> to vector<128xf32>
    %24 = vector.shape_cast %23 : vector<128xf32> to vector<1x128xf32>
    %cst_12 = arith.constant 1.250000e-01 : f32
    %25 = vector.broadcast %cst_12 : f32 to vector<1x128xf32>
    %26 = arith.mulf %24, %25 : vector<1x128xf32>
    %27 = vector.broadcast %26 : vector<1x128xf32> to vector<8x128xf32>
    %28 = arith.subf %22, %27 : vector<8x128xf32>
    %29 = arith.mulf %28, %28 : vector<8x128xf32>
    %cst_13 = arith.constant dense<0.000000e+00> : vector<128xf32>
    %30 = vector.multi_reduction <add>, %29, %cst_13 [0] : vector<8x128xf32> to vector<128xf32>
    %31 = vector.shape_cast %30 : vector<128xf32> to vector<1x128xf32>
    %cst_14 = arith.constant 1.250000e-01 : f32
    %32 = vector.broadcast %cst_14 : f32 to vector<1x128xf32>
    %33 = arith.mulf %31, %32 : vector<1x128xf32>
    %cst_15 = arith.constant 9.99999974E-6 : f32
    %34 = vector.broadcast %cst_15 : f32 to vector<1x128xf32>
    %35 = arith.addf %33, %34 : vector<1x128xf32>
    %36 = math.rsqrt %35 : vector<1x128xf32>
    %37 = arith.mulf %2, %36 : vector<1x128xf32>
    %38 = vector.broadcast %37 : vector<1x128xf32> to vector<8x128xf32>
    %39 = arith.mulf %28, %38 : vector<8x128xf32>
    %40 = vector.broadcast %3 : vector<1x128xf32> to vector<8x128xf32>
    %41 = arith.addf %39, %40 : vector<8x128xf32>
    %c16 = arith.constant 16 : index
    %c0_16 = arith.constant 0 : index
    %42 = vector.load %arg1[%c16, %c0_16] : memref<272x128xf32, #tpu.memory_space<vmem>>, vector<128x128xf32>
    %cst_17 = arith.constant dense<0.000000e+00> : vector<8x128xf32>
    %43 = tpu.matmul %41, %42, %cst_17 {dimension_numbers = #tpu.dot_dimension_numbers<[1], [0], [0], [1], [0, 0, 1, 1], [], []>} : vector<8x128xf32>, vector<128x128xf32>, vector<8x128xf32> -> vector<8x128xf32>
    %44 = vector.broadcast %4 : vector<1x128xf32> to vector<8x128xf32>
    %45 = arith.addf %43, %44 : vector<8x128xf32>
    %cst_18 = arith.constant 0.000000e+00 : f32
    %46 = vector.broadcast %cst_18 : f32 to vector<8x128xf32>
    %47 = arith.maximumf %45, %46 : vector<8x128xf32>
    %cst_19 = arith.constant dense<0.000000e+00> : vector<128xf32>
    %48 = vector.multi_reduction <add>, %47, %cst_19 [0] : vector<8x128xf32> to vector<128xf32>
    %49 = vector.shape_cast %48 : vector<128xf32> to vector<1x128xf32>
    %cst_20 = arith.constant 1.250000e-01 : f32
    %50 = vector.broadcast %cst_20 : f32 to vector<1x128xf32>
    %51 = arith.mulf %49, %50 : vector<1x128xf32>
    %52 = vector.broadcast %51 : vector<1x128xf32> to vector<8x128xf32>
    %53 = arith.subf %47, %52 : vector<8x128xf32>
    %54 = arith.mulf %53, %53 : vector<8x128xf32>
    %cst_21 = arith.constant dense<0.000000e+00> : vector<128xf32>
    %55 = vector.multi_reduction <add>, %54, %cst_21 [0] : vector<8x128xf32> to vector<128xf32>
    %56 = vector.shape_cast %55 : vector<128xf32> to vector<1x128xf32>
    %cst_22 = arith.constant 1.250000e-01 : f32
    %57 = vector.broadcast %cst_22 : f32 to vector<1x128xf32>
    %58 = arith.mulf %56, %57 : vector<1x128xf32>
    %cst_23 = arith.constant 9.99999974E-6 : f32
    %59 = vector.broadcast %cst_23 : f32 to vector<1x128xf32>
    %60 = arith.addf %58, %59 : vector<1x128xf32>
    %61 = math.rsqrt %60 : vector<1x128xf32>
    %62 = arith.mulf %5, %61 : vector<1x128xf32>
    %63 = vector.broadcast %62 : vector<1x128xf32> to vector<8x128xf32>
    %64 = arith.mulf %53, %63 : vector<8x128xf32>
    %65 = vector.broadcast %6 : vector<1x128xf32> to vector<8x128xf32>
    %66 = arith.addf %64, %65 : vector<8x128xf32>
    %c144 = arith.constant 144 : index
    %c0_24 = arith.constant 0 : index
    %67 = vector.load %arg1[%c144, %c0_24] : memref<272x128xf32, #tpu.memory_space<vmem>>, vector<128x128xf32>
    %cst_25 = arith.constant dense<0.000000e+00> : vector<8x128xf32>
    %68 = tpu.matmul %66, %67, %cst_25 {dimension_numbers = #tpu.dot_dimension_numbers<[1], [0], [0], [1], [0, 0, 1, 1], [], []>} : vector<8x128xf32>, vector<128x128xf32>, vector<8x128xf32> -> vector<8x128xf32>
    %69 = vector.broadcast %7 : vector<1x128xf32> to vector<8x128xf32>
    %70 = arith.addf %68, %69 : vector<8x128xf32>
    %71 = arith.negf %70 : vector<8x128xf32>
    %72 = math.exp %71 : vector<8x128xf32>
    %cst_26 = arith.constant 1.000000e+00 : f32
    %73 = vector.broadcast %cst_26 : f32 to vector<8x128xf32>
    %74 = arith.addf %73, %72 : vector<8x128xf32>
    %75 = arith.divf %73, %74 : vector<8x128xf32>
    %c0_27 = arith.constant 0 : index
    %c0_28 = arith.constant 0 : index
    %76 = vector.load %arg2[%c0_27, %c0_28] : memref<8x128xf32, #tpu.memory_space<vmem>>, vector<8x128xf32>
    tpu.vector_store %arg2[%c0_27, %c0_28], %75 {strides = array<i32>} : memref<8x128xf32, #tpu.memory_space<vmem>>, vector<8x128xf32>,
    return
  }
}

</mosaic_0001>

<bundles_post_ra>
// kernel: tpu_custom_call.1
= control target key start
LH: loop header
LB: loop body
LE: loop exit
PB: predicated region body
PF: predicated region fallthrough
CT: control target
= control target key end

     0   :  { %7 = vsyncpa [#allocation3], 0  ;;  %s624_s0 = inlined_call_operand.vmem [shape: f32[8,2], index: 0, kind: input, shape index: {}]   ;;  %s625_s1 = inlined_call_operand.hbm [shape: f32[272,128], index: 1, kind: input, shape index: {}]   ;;  %s626_s2 = inlined_call_operand.hbm [shape: f32[8,128], index: 2, kind: output, shape index: {}]  }
   0x1   :  { %8 = vsyncpa [#allocation4], 0  ;;  %s550_s9 = smov [#allocation2]   ;;  %s502_s13 = scalar_lea.hbm %s625_s1, 4352 }
   0x2   :  { %s16_s10 = sshll.u32 %s550_s9, 4  ;;  %p503_p0 = scmp.ne.s32.totalorder %s625_s1, %s502_s13  ;;  %s17_s10 = int_to_ptr.vmem [resolvable:$true] %s16_s10 }
   0x3   :  { %p506_p1 = scmp.lt.u32.totalorder %s502_s13, %s625_s1 }
   0x5   :  { %p508_p2 = pnand %p506_p1, %p503_p0 }
   0x7   :  { %511 = shalt.err (!%p508_p2)
}
   0x8   :  { %s512_s18 = scalar_lea.vmem %s17_s10, 4352  ;;  %p517_p4 = scmp.lt.s32.totalorder %s17_s10, %s17_s10 }
   0x9   :  { %p513_p3 = scmp.ne.s32.totalorder %s17_s10, %s512_s18  ;;  %p518_p5 = scmp.lt.s32.totalorder %s512_s18, %s512_s18 }
   0xb   :  { %p519_p6 = por %p518_p5, %p517_p4 }
   0xd   :  { %p520_p7 = pnand %p519_p6, %p513_p3 }
   0xf   :  { %523 = shalt.err (!%p520_p7)
}
  0x10   :  { %s551_s19 = smov 128   ;;  %s552_s20 = smov 8  }
  0x11   :  { %22 = dma.hbm_to_vmem [thread:$0]  %s625_s1, 4352, %s17_s10, [#allocation3], %s551_s19, %s551_s19, %s552_s20  }
  0x12   :  { %546 = dma.done.wait [#allocation3], 4352  }
  0x13   :  { %547 = vsyncadd [#allocation3], 4294962944  ;;  %v553_v0 = vmov 0   ;;  %v26_v1 = vld [vmem:[%s624_s0] sm:$0xff]  ;;  %v554_v2 = vmov 1   ;;  %v91_v3 = vld [vmem:[#allocation2 + $0x10] sm:$0xff]  ;;  %v81_v56 = vlaneseq }
  0x14   :  { %492 = vset.pattern.permute.xlu0 %v553_v0  ;;  %v92_v4 = vld [vmem:[#allocation2 + $0x18] sm:$0xff]  ;;  %v555_v6 = vmov 0.0|0.0   ;;  %v93_v7 = vld [vmem:[#allocation2 + $0x20] sm:$0xff]  ;;  %v94_v8 = vld [vmem:[#allocation2 + $0x28] sm:$0xff]  ;;  %vm556_vm0 = vmmov 0   ;;  %v557_v21 = vmov 0.0  }
  0x15   :  { %37 = vperm.xlu0 %492, %v26_v1   ;;  %v436_v5 = vpack.c.bf16 %v92_v4, %v91_v3  ;;  %435 = vmatprep.subr.bf16.mxu0 %v555_v6  ;;  %v439_v9 = vpack.c.bf16 %v94_v8, %v93_v7  ;;  %v95_v10 = vld [vmem:[#allocation2 + $0x30] sm:$0xff]  ;;  %v96_v11 = vld [vmem:[#allocation2 + $0x38] sm:$0xff]  ;;  %v97_v13 = vld [vmem:[#allocation2 + $0x40] sm:$0xff]  ;;  %v598_v57 = vshrl.u32 %v81_v56, 7  ;;  %s558_s0 = smov [#allocation5]  }
  0x16   :  { %459 = vmatprep.subr.bf16.mxu1 %v555_v6  ;;  %v442_v12 = vpack.c.bf16 %v96_v11, %v95_v10  ;;  %v98_v14 = vld [vmem:[#allocation2 + $0x48] sm:$0xff]  ;;  %v99_v16 = vld [vmem:[#allocation2 + $0x50] sm:$0xff]  ;;  %v100_v17 = vld [vmem:[#allocation2 + $0x58] sm:$0xff]  ;;  %397 = vmatprep.mubr.msk.f32.mxu0 %vm556_vm0, %v557_v21  ;;  %s314_s1 = sshll.u32 %s558_s0, 4  ;;  %s315_s1 = int_to_ptr.vmem [resolvable:$true] %s314_s1 }
  0x17   :  { %437 = vmatpush3.bf16.msra.mxu0 %v436_v5  ;;  %v445_v15 = vpack.c.bf16 %v98_v14, %v97_v13  ;;  %v448_v18 = vpack.c.bf16 %v100_v17, %v99_v16  ;;  %v101_v19 = vld [vmem:[#allocation2 + $0x60] sm:$0xff]  ;;  %v102_v20 = vld [vmem:[#allocation2 + $0x68] sm:$0xff]  ;;  %432 = vmatprep.mubr.msk.f32.mxu1 %vm556_vm0, %v557_v21  ;;  %v103_v23 = vld [vmem:[#allocation2 + $0x70] sm:$0xff]  ;;  %v83_v59 = vsub.s32 0, %v598_v57  ;;  %s524_s25 = scalar_lea.vmem %s315_s1, 128  ;;  %p529_p9 = scmp.lt.s32.totalorder %s315_s1, %s315_s1 }
  0x18   :  { %438 = vmatprep.subr.bf16.mxu0 %v555_v6  ;;  %v451_v22 = vpack.c.bf16 %v102_v20, %v101_v19  ;;  %v104_v24 = vld [vmem:[#allocation2 + $0x78] sm:$0xff]  ;;  %v105_v26 = vld [vmem:[#allocation2 + $0x80] sm:$0xff]  ;;  %v106_v27 = vld [vmem:[#allocation2 + $0x88] sm:$0xff]  ;;  %p525_p8 = scmp.ne.s32.totalorder %s315_s1, %s524_s25  ;;  %p530_p10 = scmp.lt.s32.totalorder %s524_s25, %s524_s25 }
  0x19   :  { %493 = vset.pattern.permute.xlu0 %v554_v2  ;;  %v454_v25 = vpack.c.bf16 %v104_v24, %v103_v23  ;;  %v457_v28 = vpack.c.bf16 %v106_v27, %v105_v26  ;;  %v323_v29 = vld [vmem:[#allocation2] ss:$0 sm:$0xff]  ;;  %v324_v32 = vld [vmem:[#allocation2 + $0x2] ss:$0 sm:$0xff]  ;;  %v325_v33 = vld [vmem:[#allocation2 + $0x1] ss:$0 sm:$0xff] }
  0x1a   :  { %52 = vperm.xlu0 %493, %v26_v1   ;;  %v28_v58 = vld [vmem:[#allocation2 + $0x3] sm:$0x1]  ;;  %v326_v63 = vld [vmem:[#allocation2 + $0x4] ss:$0 sm:$0xff]  ;;  %v211_v2 = vld [vmem:[#allocation2 + $0x90] sm:$0xff]  ;;  %p531_p11 = por %p530_p10, %p529_p9 }
  0x1b   :  { %440 = vmatpush3.bf16.msra.mxu0 %v439_v9  ;;  %v212_v3 = vld [vmem:[#allocation2 + $0x98] sm:$0xff]  ;;  %v213_v5 = vld [vmem:[#allocation2 + $0xa0] sm:$0xff]  ;;  %v214_v7 = vld [vmem:[#allocation2 + $0xa8] sm:$0xff] }
  0x1c   :  { %441 = vmatprep.subr.bf16.mxu0 %v555_v6  ;;  %v460_v4 = vpack.c.bf16 %v212_v3, %v211_v2  ;;  %v463_v8 = vpack.c.bf16 %v214_v7, %v213_v5  ;;  %v215_v9 = vld [vmem:[#allocation2 + $0xb0] sm:$0xff]  ;;  %v216_v10 = vld [vmem:[#allocation2 + $0xb8] sm:$0xff]  ;;  %v218_v13 = vld [vmem:[#allocation2 + $0xc8] sm:$0xff]  ;;  %p532_p12 = pnand %p531_p11, %p525_p8 }
  0x1d   :  { %v466_v11 = vpack.c.bf16 %v216_v10, %v215_v9  ;;  %v220_v16 = vld [vmem:[#allocation2 + $0xd8] sm:$0xff]  ;;  %v222_v19 = vld [vmem:[#allocation2 + $0xe8] sm:$0xff]  ;;  %v223_v21 = vld [vmem:[#allocation2 + $0xf0] sm:$0xff] }
  0x1e   :  { %461 = vmatpush3.bf16.msra.mxu1 %v460_v4  ;;  %v225_v24 = vld [vmem:[#allocation2 + $0x100] sm:$0xff] }
  0x1f   :  { %443 = vmatpush3.bf16.msra.mxu0 %v442_v12  ;;  %462 = vmatprep.subr.bf16.mxu1 %v555_v6  ;;  %v217_v12 = vld [vmem:[#allocation2 + $0xc0] sm:$0xff] }
  0x20   :  { %444 = vmatprep.subr.bf16.mxu0 %v555_v6  ;;  %v469_v14 = vpack.c.bf16 %v218_v13, %v217_v12  ;;  %v327_v27 = vld [vmem:[#allocation2 + $0x5] ss:$0 sm:$0xff] }
  0x22   :  { %464 = vmatpush3.bf16.msra.mxu1 %v463_v8 }
  0x23   :  { %446 = vmatpush3.bf16.msra.mxu0 %v445_v15  ;;  %465 = vmatprep.subr.bf16.mxu1 %v555_v6  ;;  %v219_v15 = vld [vmem:[#allocation2 + $0xd0] sm:$0xff] }
  0x24   :  { %447 = vmatprep.subr.bf16.mxu0 %v555_v6  ;;  %v472_v17 = vpack.c.bf16 %v220_v16, %v219_v15 }
  0x26   :  { %467 = vmatpush3.bf16.msra.mxu1 %v466_v11 }
  0x27   :  { %449 = vmatpush3.bf16.msra.mxu0 %v448_v18  ;;  %468 = vmatprep.subr.bf16.mxu1 %v555_v6  ;;  %v221_v18 = vld [vmem:[#allocation2 + $0xe0] sm:$0xff] }
  0x28   :  { %450 = vmatprep.subr.bf16.mxu0 %v555_v6  ;;  %v475_v20 = vpack.c.bf16 %v222_v19, %v221_v18 }
  0x2a   :  { %470 = vmatpush3.bf16.msra.mxu1 %v469_v14 }
  0x2b   :  { %452 = vmatpush3.bf16.msra.mxu0 %v451_v22  ;;  %471 = vmatprep.subr.bf16.mxu1 %v555_v6  ;;  %v224_v22 = vld [vmem:[#allocation2 + $0xf8] sm:$0xff] }
  0x2c   :  { %453 = vmatprep.subr.bf16.mxu0 %v555_v6  ;;  %v478_v23 = vpack.c.bf16 %v224_v22, %v223_v21 }
  0x2e   :  { %473 = vmatpush3.bf16.msra.mxu1 %v472_v17 }
  0x2f   :  { %455 = vmatpush3.bf16.msra.mxu0 %v454_v25  ;;  %474 = vmatprep.subr.bf16.mxu1 %v555_v6  ;;  %v226_v25 = vld [vmem:[#allocation2 + $0x108] sm:$0xff] }
  0x30   :  { %456 = vmatprep.subr.bf16.mxu0 %v555_v6  ;;  %v481_v26 = vpack.c.bf16 %v226_v25, %v225_v24 }
  0x32   :  { %476 = vmatpush3.bf16.msra.mxu1 %v475_v20 }
  0x33   :  { %458 = vmatpush3.bf16.msra.mxu0 %v457_v28  ;;  %477 = vmatprep.subr.bf16.mxu1 %v555_v6 }
  0x36   :  { %479 = vmatpush3.bf16.msra.mxu1 %v478_v23 }
  0x37   :  { %480 = vmatprep.subr.bf16.mxu1 %v555_v6 }
  0x3a   :  { %482 = vmatpush3.bf16.msra.mxu1 %v481_v26 }
  0x94   :  { %v38_v30 = vpop.permute.xlu0 %37 }
  0x95   :  { %v44_v31 = vmul.f32 %v323_v29, %v38_v30 }
  0x97   :  { %v49_v35 = vadd.f32 %v324_v32, %v44_v31 }
  0x99   :  { %v53_v34 = vpop.permute.xlu0 %52 }
  0x9a   :  { %v59_v36 = vmul.f32 %v325_v33, %v53_v34 }
  0x9c   :  { %v60_v37 = vadd.f32 %v59_v36, %v49_v35 }
  0x9e   :  { %v61_v38 = vmax.f32 %v60_v37, 0.0 }
  0xa0   :  { %v62_v39 = vrot.slane %v61_v38, 4 }
  0xa2   :  { %v63_v40 = vadd.f32 %v62_v39, %v61_v38 }
  0xa4   :  { %v64_v41 = vrot.slane %v63_v40, 2 }
  0xa6   :  { %v65_v42 = vadd.f32 %v64_v41, %v63_v40 }
  0xa8   :  { %v66_v43 = vrot.slane %v65_v42, 1 }
  0xaa   :  { %v67_v44 = vadd.f32 %v66_v43, %v65_v42 }
  0xac   :  { %v68_v45 = vmul.f32 0.125, %v67_v44 }
  0xae   :  { %v69_v46 = vsub.f32 %v61_v38, %v68_v45 }
  0xb0   :  { %v70_v47 = vmul.f32 %v69_v46, %v69_v46 }
  0xb2   :  { %v71_v48 = vrot.slane %v70_v47, 4 }
  0xb4   :  { %v72_v49 = vadd.f32 %v71_v48, %v70_v47  ;;  %v31_v48 = vld [vmem:[#allocation2 + $0x6] sm:$0x1] }
  0xb6   :  { %v73_v50 = vrot.slane %v72_v49, 2 }
  0xb8   :  { %v74_v51 = vadd.f32 %v73_v50, %v72_v49 }
  0xba   :  { %v75_v52 = vrot.slane %v74_v51, 1 }
  0xbc   :  { %v76_v53 = vadd.f32 %v75_v52, %v74_v51  ;;  %v328_v52 = vld [vmem:[#allocation2 + $0x7] ss:$0 sm:$0xff] }
  0xbe   :  { %v77_v54 = vmul.f32 0.125, %v76_v53 }
  0xc0   :  { %v78_v55 = vadd.f32 1e-05, %v77_v54 }
  0xc2   :  { %494 = vrsqrt.f32 %v78_v55  ;;  %v329_v55 = vld [vmem:[#allocation2 + $0x8] ss:$0 sm:$0xff] }
  0xcc   :  { %v495_v60 = vpop.eup %494 }
  0xcd   :  { %v80_v61 = vmul.f32 %v495_v60, %v28_v58 }
  0xcf   :  { %v84_v62 = vrot.slane %v80_v61, %v83_v59 }
  0xd1   :  { %v85_v0 = vmul.f32 %v84_v62, %v69_v46 }
  0xd3   :  { %v90_v1 = vadd.f32 %v326_v63, %v85_v0 }
  0xd5   :  { %398 = vmatmul.mubr.f32.vlgmr.msra.gmra.mrb[0].mxu0 %v90_v1 }
 0x1a8   :  { %v177_v28 = vpop.f32.mrb[0].mxu0 }
 0x1a9   :  { %v178_v29 = vadd.f32 %v327_v27, %v177_v28  ;;  %v399_v30 = vpop.f32.mrb[1].mxu0 }
 0x1ab   :  { %v181_v31 = vmax.f32 %v178_v29, 0.0 }
 0x1ad   :  { %v182_v32 = vrot.slane %v181_v31, 4 }
 0x1af   :  { %v183_v33 = vadd.f32 %v182_v32, %v181_v31 }
 0x1b1   :  { %v184_v34 = vrot.slane %v183_v33, 2 }
 0x1b3   :  { %v185_v35 = vadd.f32 %v184_v34, %v183_v33 }
 0x1b5   :  { %v186_v36 = vrot.slane %v185_v35, 1 }
 0x1b7   :  { %v187_v37 = vadd.f32 %v186_v36, %v185_v35 }
 0x1b9   :  { %v188_v38 = vmul.f32 0.125, %v187_v37 }
 0x1bb   :  { %v189_v39 = vsub.f32 %v181_v31, %v188_v38 }
 0x1bd   :  { %v190_v40 = vmul.f32 %v189_v39, %v189_v39 }
 0x1bf   :  { %v191_v41 = vrot.slane %v190_v40, 4 }
 0x1c1   :  { %v192_v42 = vadd.f32 %v191_v41, %v190_v40 }
 0x1c3   :  { %v193_v43 = vrot.slane %v192_v42, 2 }
 0x1c5   :  { %v194_v44 = vadd.f32 %v193_v43, %v192_v42 }
 0x1c7   :  { %v195_v6 = vrot.slane %v194_v44, 1 }
 0x1c9   :  { %v196_v45 = vadd.f32 %v195_v6, %v194_v44 }
 0x1cb   :  { %v197_v46 = vmul.f32 0.125, %v196_v45 }
 0x1cd   :  { %v198_v47 = vadd.f32 1e-05, %v197_v46 }
 0x1cf   :  { %496 = vrsqrt.f32 %v198_v47 }
 0x1d9   :  { %v497_v49 = vpop.eup %496 }
 0x1da   :  { %v200_v50 = vmul.f32 %v497_v49, %v31_v48 }
 0x1dc   :  { %v204_v51 = vrot.slane %v200_v50, %v83_v59 }
 0x1de   :  { %v205_v53 = vmul.f32 %v204_v51, %v189_v39 }
 0x1e0   :  { %v210_v54 = vadd.f32 %v328_v52, %v205_v53 }
 0x1e2   :  { %433 = vmatmul.mubr.f32.vlgmr.msra.gmra.mrb[0].mxu1 %v210_v54 }
 0x2b5   :  { %v297_v56 = vpop.f32.mrb[0].mxu1 }
 0x2b6   :  { %v298_v58 = vadd.f32 %v329_v55, %v297_v56  ;;  %v434_v60 = vpop.f32.mrb[1].mxu1 }
 0x2b8   :  { %v330_v61 = vmul.f32 -1.442695, %v298_v58 }
 0x2ba   :  { %498 = vpow2.f32 %v330_v61 }
 0x2c4   :  { %v499_v62 = vpop.eup %498 }
 0x2c5   :  { %v304_v63 = vadd.f32 1.0, %v499_v62 }
 0x2c7   :  { %500 = vrcp.f32 %v304_v63 }
 0x2d1   :  { %v501_v0 = vpop.eup %500 }
 0x2d2   :  { %307 = vst [vmem:[#allocation5] sm:$0xff] %v501_v0 }
 0x2d3   :  { %535 = shalt.err (!%p532_p12)
}
 0x2d4   :  { %s536_s28 = scalar_lea.hbm %s626_s2, 128 }
 0x2d5   :  { %p537_p13 = scmp.ne.s32.totalorder %s626_s2, %s536_s28  ;;  %p540_p0 = scmp.lt.u32.totalorder %s536_s28, %s626_s2 }
 0x2d7   :  { %p542_p1 = pnand %p540_p0, %p537_p13 }
 0x2d9   :  { %545 = shalt.err (!%p542_p1)
}
 0x2da   :  { %317 = dma.vmem_to_hbm [thread:$0]  %s315_s1, 128, %s626_s2, [#allocation4]  }
 0x2db   :  { %548 = dma.done.wait [#allocation4], 128  }
 0x2dc   :  { %549 = vsyncadd [#allocation4], 4294967168 }
 0x2dd   :  { %321 = vsyncpa [#allocation3], 1 }
 0x2de   :  { %322 = vsyncpa [#allocation4], 1 }

</bundles_post_ra>
